<compile_context>
chip_gen: v6e
topology: v6e:2x2x1
jax: 0.10.0
libtpu: 0.0.40
codegen_flags: <defaults>
</compile_context>

<pallas_src>
import functools

import jax
import jax.numpy as jnp
from jax.experimental import pallas as pl
from jax.experimental.pallas import tpu as pltpu

HIDDEN = 128


def _round_up(x, m):
    return ((x + m - 1) // m) * m


_CANDIDATE_TILES = (2048, 1536, 1024, 768, 512, 384, 256, 128, 64, 32, 16, 8)


def _pick_batch_tile(B, block_b):
    """Pick a batch tile: multiple of 8, <= block_b, minimal padding waste,
    and >=2 grid steps for large batches (v7x dual TensorCore)."""
    block_b = max(8, (block_b // 8) * 8)          # keep the (8, .) sublane rule
    b8 = _round_up(B, 8)
    if b8 <= block_b:
        if b8 >= 1024:
            # Large batch fits in one tile: split in two so v7x's 2 TCs both work.
            return _round_up((b8 + 1) // 2, 8)
        return b8
    best, best_waste = 8, None
    for tb in _CANDIDATE_TILES:                   # descending: ties keep larger tile
        if tb > block_b:
            continue
        waste = _round_up(B, tb) - B
        if best_waste is None or waste < best_waste:
            best, best_waste = tb, waste
    return best


def dqn_kernel(x_ref, w1_ref, b1_ref, w2_ref, b2_ref, w3_ref, b3_ref, o_ref):
    # Layer 1: (TB, S) @ (S, 128) + (1, 128), ReLU.  bf16 MXU operands, f32 acc.
    h1 = jnp.dot(x_ref[...].astype(jnp.bfloat16), w1_ref[...],
                 preferred_element_type=jnp.float32)
    h1 = jnp.maximum(h1 + b1_ref[...], 0.0)
    # Layer 2: (TB, 128) @ (128, 128) + (1, 128), ReLU.
    h2 = jnp.dot(h1.astype(jnp.bfloat16), w2_ref[...],
                 preferred_element_type=jnp.float32)
    h2 = jnp.maximum(h2 + b2_ref[...], 0.0)
    # Output layer: (TB, 128) @ (128, A) + (1, A).  Narrow (A-lane) store.
    out = jnp.dot(h2.astype(jnp.bfloat16), w3_ref[...],
                  preferred_element_type=jnp.float32)
    o_ref[...] = (out + b3_ref[...]).astype(o_ref.dtype)


def prepare_params(w1, b1, w2, b2, w3, b3):
    """One-time parameter prep: bf16 weights for the MXU, f32 biases for the VPU.

    Call once (weights are constant across DQN inference steps) and pass the
    result to dqn_forward, instead of paying cast/pad XLA ops on every call.
    """
    return (w1.astype(jnp.bfloat16), b1.astype(jnp.float32),
            w2.astype(jnp.bfloat16), b2.astype(jnp.float32),
            w3.astype(jnp.bfloat16), b3.astype(jnp.float32))


@functools.partial(jax.jit, static_argnames=("block_b",))
def dqn_forward(x, w1, b1, w2, b2, w3, b3, *, block_b=2048):
    """Fused DQN MLP forward.

    x:  (B, state_size) float32
    w1: (state_size, 128), b1: (1, 128)
    w2: (128, 128),        b2: (1, 128)
    w3: (128, action_size), b3: (1, action_size)
    returns: (B, action_size) float32
    """
    B, S = x.shape
    H = w1.shape[1]
    A = w3.shape[1]

    # Defensive: if params were not prepared, cast here (trace-time no-op when
    # they already have the right dtypes).
    def _as(a, dt):
        return a if a.dtype == dt else a.astype(dt)
    w1 = _as(w1, jnp.bfloat16); w2 = _as(w2, jnp.bfloat16); w3 = _as(w3, jnp.bfloat16)
    b1 = _as(b1, jnp.float32);  b2 = _as(b2, jnp.float32);  b3 = _as(b3, jnp.float32)

    # Batch tiling only -- feature (S) and action (A) dims stay unpadded and use
    # the full-extent-dim exception in their BlockSpecs.
    TB = _pick_batch_tile(B, block_b)
    B_pad = _round_up(B, TB)
    x_p = x if B_pad == B else jnp.pad(x, ((0, B_pad - B), (0, 0)))

    grid = (B_pad // TB,)

    out = pl.pallas_call(
        dqn_kernel,
        out_shape=jax.ShapeDtypeStruct((B_pad, A), jnp.float32),
        grid=grid,
        in_specs=[
            pl.BlockSpec((TB, S), lambda i: (i, 0)),   # x: tiled over batch
            pl.BlockSpec((S, H), lambda i: (0, 0)),    # w1: resident in VMEM
            pl.BlockSpec((1, H), lambda i: (0, 0)),    # b1: resident
            pl.BlockSpec((H, H), lambda i: (0, 0)),    # w2: resident
            pl.BlockSpec((1, H), lambda i: (0, 0)),    # b2: resident
            pl.BlockSpec((H, A), lambda i: (0, 0)),    # w3: resident
            pl.BlockSpec((1, A), lambda i: (0, 0)),    # b3: resident
        ],
        out_specs=pl.BlockSpec((TB, A), lambda i: (i, 0)),
        compiler_params=pltpu.CompilerParams(
            dimension_semantics=("parallel",)),
    )(x_p, w1, b1, w2, b2, w3, b3)

    return out if B_pad == B else out[:B]


def init_params(key, state_size, action_size, hidden=HIDDEN):
    """Deterministic synthetic parameters (PyTorch-style uniform fan-in init)."""
    ks = jax.random.split(key, 6)

    def uniform(k, shape, fan_in):
        bound = 1.0 / jnp.sqrt(fan_in)
        return jax.random.uniform(k, shape, jnp.float32, -bound, bound)

    # Stored as (in, out) so the kernel computes x @ W + b (== torch x @ W.T + b).
    w1 = uniform(ks[0], (state_size, hidden), state_size)
    b1 = uniform(ks[1], (1, hidden), state_size)
    w2 = uniform(ks[2], (hidden, hidden), hidden)
    b2 = uniform(ks[3], (1, hidden), hidden)
    w3 = uniform(ks[4], (hidden, action_size), hidden)
    b3 = uniform(ks[5], (1, action_size), hidden)
    return w1, b1, w2, b2, w3, b3


if __name__ == "__main__":
    key = jax.random.PRNGKey(0)
    k_x, k_p = jax.random.split(key)

    batch = 8
    state_size = 16
    action_size = 4

    x = jax.random.normal(k_x, (batch, state_size), dtype=jnp.float32)
    params_f32 = init_params(k_p, state_size, action_size)

    # One-time parameter prep (hoisted out of the forward call).
    params = prepare_params(*params_f32)

    out = dqn_forward(x, *params)
    out = jax.block_until_ready(out)

    # Reference check in plain f32 JAX (kernel uses bf16 MXU operands with f32
    # accumulation, so use a bf16-appropriate tolerance).
    w1, b1, w2, b2, w3, b3 = params_f32
    ref = jnp.maximum(x @ w1 + b1, 0.0)
    ref = jnp.maximum(ref @ w2 + b2, 0.0)
    ref = ref @ w3 + b3
    assert out.shape == (batch, action_size), out.shape
    assert jnp.allclose(out, ref, atol=2e-2, rtol=2e-2), (
        f"max abs err {jnp.max(jnp.abs(out - ref))}")

    print("KERNEL_OK")
</pallas_src>

<mosaic_0001>
module attributes {stable_mosaic.version = 11 : i64} {
  func.func @dqn_kernel(%arg0: i32, %arg1: memref<8x16xf32, #tpu.memory_space<vmem>>, %arg2: memref<16x128xbf16, #tpu.memory_space<vmem>>, %arg3: memref<1x128xf32, #tpu.memory_space<vmem>>, %arg4: memref<128x128xbf16, #tpu.memory_space<vmem>>, %arg5: memref<1x128xf32, #tpu.memory_space<vmem>>, %arg6: memref<128x4xbf16, #tpu.memory_space<vmem>>, %arg7: memref<1x4xf32, #tpu.memory_space<vmem>>, %arg8: memref<8x4xf32, #tpu.memory_space<vmem>>) attributes {dimension_semantics = [#tpu.dimension_semantics<parallel>], iteration_bounds = array<i64: 1>, scalar_prefetch = 0 : i64, scratch_operands = 0 : i64, tpu.core_type = #tpu.core_type<tc>, window_params = [{transform_indices = @transform_0, window_bounds = array<i64: 8, 16>}, {pipeline_mode = #tpu.pipeline_mode<synchronous>, transform_indices = @transform_1, window_bounds = array<i64: 16, 128>}, {pipeline_mode = #tpu.pipeline_mode<synchronous>, transform_indices = @transform_2, window_bounds = array<i64: 1, 128>}, {pipeline_mode = #tpu.pipeline_mode<synchronous>, transform_indices = @transform_3, window_bounds = array<i64: 128, 128>}, {pipeline_mode = #tpu.pipeline_mode<synchronous>, transform_indices = @transform_4, window_bounds = array<i64: 1, 128>}, {pipeline_mode = #tpu.pipeline_mode<synchronous>, transform_indices = @transform_5, window_bounds = array<i64: 128, 4>}, {pipeline_mode = #tpu.pipeline_mode<synchronous>, transform_indices = @transform_6, window_bounds = array<i64: 1, 4>}, {transform_indices = @transform_7, window_bounds = array<i64: 8, 4>}]} {
    %c0 = arith.constant 0 : index
    %c0_0 = arith.constant 0 : index
    %0 = vector.load %arg1[%c0, %c0_0] : memref<8x16xf32, #tpu.memory_space<vmem>>, vector<8x16xf32>
    %1 = arith.truncf %0 : vector<8x16xf32> to vector<8x16xbf16>
    %c0_1 = arith.constant 0 : index
    %c0_2 = arith.constant 0 : index
    %2 = vector.load %arg2[%c0_1, %c0_2] : memref<16x128xbf16, #tpu.memory_space<vmem>>, vector<16x128xbf16>
    %cst = arith.constant dense<0.000000e+00> : vector<8x128xf32>
    %3 = tpu.matmul %1, %2, %cst {dimension_numbers = #tpu.dot_dimension_numbers<[1], [0], [0], [1], [0, 0, 1, 1], [], []>} : vector<8x16xbf16>, vector<16x128xbf16>, vector<8x128xf32> -> vector<8x128xf32>
    %c0_3 = arith.constant 0 : index
    %c0_4 = arith.constant 0 : index
    %4 = vector.load %arg3[%c0_3, %c0_4] : memref<1x128xf32, #tpu.memory_space<vmem>>, vector<1x128xf32>
    %5 = vector.broadcast %4 : vector<1x128xf32> to vector<8x128xf32>
    %6 = arith.addf %3, %5 : vector<8x128xf32>
    %cst_5 = arith.constant 0.000000e+00 : f32
    %7 = vector.broadcast %cst_5 : f32 to vector<8x128xf32>
    %8 = arith.maximumf %6, %7 : vector<8x128xf32>
    %9 = arith.truncf %8 : vector<8x128xf32> to vector<8x128xbf16>
    %c0_6 = arith.constant 0 : index
    %c0_7 = arith.constant 0 : index
    %10 = vector.load %arg4[%c0_6, %c0_7] : memref<128x128xbf16, #tpu.memory_space<vmem>>, vector<128x128xbf16>
    %cst_8 = arith.constant dense<0.000000e+00> : vector<8x128xf32>
    %11 = tpu.matmul %9, %10, %cst_8 {dimension_numbers = #tpu.dot_dimension_numbers<[1], [0], [0], [1], [0, 0, 1, 1], [], []>} : vector<8x128xbf16>, vector<128x128xbf16>, vector<8x128xf32> -> vector<8x128xf32>
    %c0_9 = arith.constant 0 : index
    %c0_10 = arith.constant 0 : index
    %12 = vector.load %arg5[%c0_9, %c0_10] : memref<1x128xf32, #tpu.memory_space<vmem>>, vector<1x128xf32>
    %13 = vector.broadcast %12 : vector<1x128xf32> to vector<8x128xf32>
    %14 = arith.addf %11, %13 : vector<8x128xf32>
    %cst_11 = arith.constant 0.000000e+00 : f32
    %15 = vector.broadcast %cst_11 : f32 to vector<8x128xf32>
    %16 = arith.maximumf %14, %15 : vector<8x128xf32>
    %17 = arith.truncf %16 : vector<8x128xf32> to vector<8x128xbf16>
    %c0_12 = arith.constant 0 : index
    %c0_13 = arith.constant 0 : index
    %18 = vector.load %arg6[%c0_12, %c0_13] : memref<128x4xbf16, #tpu.memory_space<vmem>>, vector<128x4xbf16>
    %cst_14 = arith.constant dense<0.000000e+00> : vector<8x4xf32>
    %19 = tpu.matmul %17, %18, %cst_14 {dimension_numbers = #tpu.dot_dimension_numbers<[1], [0], [0], [1], [0, 0, 1, 1], [], []>} : vector<8x128xbf16>, vector<128x4xbf16>, vector<8x4xf32> -> vector<8x4xf32>
    %c0_15 = arith.constant 0 : index
    %c0_16 = arith.constant 0 : index
    %20 = vector.load %arg7[%c0_15, %c0_16] : memref<1x4xf32, #tpu.memory_space<vmem>>, vector<1x4xf32>
    %21 = vector.broadcast %20 : vector<1x4xf32> to vector<8x4xf32>
    %22 = arith.addf %19, %21 : vector<8x4xf32>
    %c0_17 = arith.constant 0 : index
    %c0_18 = arith.constant 0 : index
    %23 = vector.load %arg8[%c0_17, %c0_18] : memref<8x4xf32, #tpu.memory_space<vmem>>, vector<8x4xf32>
    tpu.vector_store %arg8[%c0_17, %c0_18], %22 {strides = array<i32>} : memref<8x4xf32, #tpu.memory_space<vmem>>, vector<8x4xf32>,
    return
  }
  func.func @transform_0(%arg0: i32) -> (i32, i32) {
    %c0_i32 = arith.constant 0 : i32
    %c0_i32_0 = arith.constant 0 : i32
    return %arg0, %c0_i32 : i32, i32
  }
  func.func @transform_1(%arg0: i32) -> (i32, i32) {
    %c0_i32 = arith.constant 0 : i32
    %c0_i32_0 = arith.constant 0 : i32
    %c0_i32_1 = arith.constant 0 : i32
    return %c0_i32, %c0_i32_0 : i32, i32
  }
  func.func @transform_2(%arg0: i32) -> (i32, i32) {
    %c0_i32 = arith.constant 0 : i32
    %c0_i32_0 = arith.constant 0 : i32
    %c0_i32_1 = arith.constant 0 : i32
    return %c0_i32, %c0_i32_0 : i32, i32
  }
  func.func @transform_3(%arg0: i32) -> (i32, i32) {
    %c0_i32 = arith.constant 0 : i32
    %c0_i32_0 = arith.constant 0 : i32
    %c0_i32_1 = arith.constant 0 : i32
    return %c0_i32, %c0_i32_0 : i32, i32
  }
  func.func @transform_4(%arg0: i32) -> (i32, i32) {
    %c0_i32 = arith.constant 0 : i32
    %c0_i32_0 = arith.constant 0 : i32
    %c0_i32_1 = arith.constant 0 : i32
    return %c0_i32, %c0_i32_0 : i32, i32
  }
  func.func @transform_5(%arg0: i32) -> (i32, i32) {
    %c0_i32 = arith.constant 0 : i32
    %c0_i32_0 = arith.constant 0 : i32
    %c0_i32_1 = arith.constant 0 : i32
    return %c0_i32, %c0_i32_0 : i32, i32
  }
  func.func @transform_6(%arg0: i32) -> (i32, i32) {
    %c0_i32 = arith.constant 0 : i32
    %c0_i32_0 = arith.constant 0 : i32
    %c0_i32_1 = arith.constant 0 : i32
    return %c0_i32, %c0_i32_0 : i32, i32
  }
  func.func @transform_7(%arg0: i32) -> (i32, i32) {
    %c0_i32 = arith.constant 0 : i32
    %c0_i32_0 = arith.constant 0 : i32
    return %arg0, %c0_i32 : i32, i32
  }
}

</mosaic_0001>

<bundles_post_ra>
// kernel: dqn_forward.1
= control target key start
LH: loop header
LB: loop body
LE: loop exit
PB: predicated region body
PF: predicated region fallthrough
CT: control target
= control target key end

     0   :  { %12 = vsyncpa [#allocation3], 0  ;;  %s634_s0 = inlined_call_operand.hbm [shape: f32[8,16], index: 0, kind: input, shape index: {}]   ;;  %s635_s1 = inlined_call_operand.hbm [shape: bf16[16,128], index: 1, kind: input, shape index: {}]   ;;  %s636_s2 = inlined_call_operand.vmem [shape: f32[1,128], index: 2, kind: input, shape index: {}]   ;;  %s637_s3 = inlined_call_operand.vmem [shape: bf16[128,128], index: 3, kind: input, shape index: {}]   ;;  %s638_s4 = inlined_call_operand.vmem [shape: f32[1,128], index: 4, kind: input, shape index: {}]   ;;  %s639_s5 = inlined_call_operand.vmem [shape: bf16[128,4], index: 5, kind: input, shape index: {}]   ;;  %s640_s6 = inlined_call_operand.vmem [shape: f32[1,4], index: 6, kind: input, shape index: {}]   ;;  %s641_s7 = inlined_call_operand.vmem [shape: f32[8,4], index: 7, kind: output, shape index: {}]  }
   0x1   :  { %13 = vsyncpa [#allocation5], 0  ;;  %s502_s24 = smov [#allocation2]   ;;  %s503_s26 = smov [#allocation4]  }
   0x2   :  { %s20_s25 = sshll.u32 %s502_s24, 4  ;;  %s29_s27 = sshll.u32 %s503_s26, 4  ;;  %s21_s25 = int_to_ptr.vmem [resolvable:$true] %s20_s25  ;;  %s30_s27 = int_to_ptr.vmem [resolvable:$true] %s29_s27 }
   0x3   :  { %s466_s28 = scalar_lea.vmem %s21_s25, 128  ;;  %p471_p1 = scmp.lt.s32.totalorder %s21_s25, %s21_s25 }
   0x4   :  { %p467_p0 = scmp.ne.s32.totalorder %s21_s25, %s466_s28  ;;  %p472_p2 = scmp.lt.s32.totalorder %s466_s28, %s466_s28 }
   0x6   :  { %p473_p3 = por %p472_p2, %p471_p1 }
   0x8   :  { %p474_p4 = pnand %p473_p3, %p467_p0 }
   0xa   :  { %477 = shalt.err (!%p474_p4)
}
   0xb   :  { %23 = dma.hbm_to_vmem [thread:$0]  %s634_s0, 128, %s21_s25, [#allocation3]  }
   0xc   :  { %s486_s8 = scalar_lea.vmem %s30_s27, 128  ;;  %p491_p6 = scmp.lt.s32.totalorder %s30_s27, %s30_s27 }
   0xd   :  { %p487_p5 = scmp.ne.s32.totalorder %s30_s27, %s486_s8  ;;  %p492_p7 = scmp.lt.s32.totalorder %s486_s8, %s486_s8 }
   0xf   :  { %p493_p8 = por %p492_p7, %p491_p6 }
  0x11   :  { %p494_p9 = pnand %p493_p8, %p487_p5 }
  0x13   :  { %497 = shalt.err (!%p494_p9)
}
  0x14   :  { %s504_s9 = smov 64   ;;  %s505_s10 = smov 4  }
  0x15   :  { %35 = dma.hbm_to_vmem [thread:$0]  %s635_s1, 128, %s30_s27, [#allocation5], %s504_s9, %s504_s9, %s505_s10  }
  0x16   :  { %498 = dma.done.wait [#allocation3], 128  }
  0x17   :  { %499 = vsyncadd [#allocation3], 4294967168 }
  0x18   :  { %500 = dma.done.wait [#allocation5], 128  }
  0x19   :  { %501 = vsyncadd [#allocation5], 4294967168  ;;  %v506_v0 = vmov 0.0   ;;  %vm507_vm0 = vmmov 0   ;;  %v441_v1 = vld [vmem:[#allocation4] sm:$0xff]   ;;  %v53_v2 = vld [vmem:[#allocation2] sm:$0xff] }
  0x1a   :  { %389 = vmatprep.subr.bf16.mxu0 %v506_v0  ;;  %391 = vmatprep.mubr.msk.bf16.mxu0 %vm507_vm0, %v506_v0  ;;  %v54_v3 = vpack.c.bf16 %v53_v2, %v53_v2  ;;  %vm70_vm1 = vcmask 130048   ;;  %v442_v4 = vld [vmem:[%s637_s3 + $0x38] sm:$0xff]   ;;  %v443_v5 = vld [vmem:[%s637_s3 + $0x30] sm:$0xff]   ;;  %v444_v6 = vld [vmem:[%s637_s3 + $0x28] sm:$0xff]   ;;  %vm340_vm2 = vcmask 31744  }
  0x1b   :  { %395 = vmatprep.subr.bf16.mxu1 %v506_v0  ;;  %411 = vmatprep.mubr.msk.bf16.mxu1 %vm507_vm0, %v506_v0  ;;  %v445_v7 = vld [vmem:[%s637_s3 + $0x20] sm:$0xff]   ;;  %v446_v8 = vld [vmem:[%s637_s3 + $0x18] sm:$0xff]   ;;  %v447_v9 = vld [vmem:[%s637_s3 + $0x10] sm:$0xff]  }
  0x1c   :  { %390 = vmatpush3.bf16.msra.mxu0 %v441_v1  ;;  %396 = vmatpush3.bf16.msra.mxu1 %v442_v4  ;;  %v448_v10 = vld [vmem:[%s637_s3 + $0x8] sm:$0xff]   ;;  %v449_v11 = vld [vmem:[%s637_s3] sm:$0xff]   ;;  %v450_v12 = vld [vmem:[%s639_s5 + $0x38] sm:$0xff]  }
  0x1d   :  { %415 = vmatprep.subr.bf16.mxu0 %v506_v0  ;;  %397 = vmatprep.subr.bf16.mxu1 %v506_v0  ;;  %v451_v13 = vld [vmem:[%s639_s5 + $0x30] sm:$0xff]   ;;  %v452_v14 = vld [vmem:[%s639_s5 + $0x28] sm:$0xff]   ;;  %v453_v15 = vld [vmem:[%s639_s5 + $0x20] sm:$0xff]  }
  0x1e   :  { %v454_v16 = vld [vmem:[%s639_s5 + $0x18] sm:$0xff]   ;;  %v455_v17 = vld [vmem:[%s639_s5 + $0x10] sm:$0xff]   ;;  %v348_v18 = vld [vmem:[%s636_s2] ss:$0 sm:$0xff] }
  0x1f   :  { %392 = vmatmul.mubr.msk.bf16.vlgmr.msra.gmra.mxu0 %vm70_vm1, %v54_v3  ;;  %v456_v26 = vld [vmem:[%s639_s5 + $0x8] sm:$0xff]   ;;  %v457_v27 = vld [vmem:[%s639_s5] sm:$0xff]  }
  0x20   :  { %431 = vmatprep.mubr.msk.bf16.mxu0 %vm507_vm0, %v506_v0  ;;  %398 = vmatpush3.bf16.msra.mxu1 %v443_v5  ;;  %v351_v28 = vld [vmem:[%s638_s4] ss:$0 sm:$0xff] }
  0x21   :  { %399 = vmatprep.subr.bf16.mxu1 %v506_v0  ;;  %416 = vmatpush3.bf16.msra.mxu0 %v450_v12  ;;  %v360_v36 = vld [vmem:[%s640_s6] ss:$0 sm:$0xff] }
  0x22   :  { %417 = vmatprep.subr.bf16.mxu0 %v506_v0 }
  0x24   :  { %400 = vmatpush3.bf16.msra.mxu1 %v444_v6 }
  0x25   :  { %401 = vmatprep.subr.bf16.mxu1 %v506_v0  ;;  %418 = vmatpush3.bf16.msra.mxu0 %v451_v13 }
  0x26   :  { %419 = vmatprep.subr.bf16.mxu0 %v506_v0 }
  0x28   :  { %402 = vmatpush3.bf16.msra.mxu1 %v445_v7 }
  0x29   :  { %403 = vmatprep.subr.bf16.mxu1 %v506_v0  ;;  %420 = vmatpush3.bf16.msra.mxu0 %v452_v14 }
  0x2a   :  { %421 = vmatprep.subr.bf16.mxu0 %v506_v0 }
  0x2c   :  { %404 = vmatpush3.bf16.msra.mxu1 %v446_v8 }
  0x2d   :  { %405 = vmatprep.subr.bf16.mxu1 %v506_v0  ;;  %422 = vmatpush3.bf16.msra.mxu0 %v453_v15 }
  0x2e   :  { %423 = vmatprep.subr.bf16.mxu0 %v506_v0 }
  0x30   :  { %406 = vmatpush3.bf16.msra.mxu1 %v447_v9 }
  0x31   :  { %407 = vmatprep.subr.bf16.mxu1 %v506_v0  ;;  %424 = vmatpush3.bf16.msra.mxu0 %v454_v16 }
  0x32   :  { %425 = vmatprep.subr.bf16.mxu0 %v506_v0 }
  0x34   :  { %408 = vmatpush3.bf16.msra.mxu1 %v448_v10 }
  0x35   :  { %409 = vmatprep.subr.bf16.mxu1 %v506_v0  ;;  %426 = vmatpush3.bf16.msra.mxu0 %v455_v17 }
  0x36   :  { %427 = vmatprep.subr.bf16.mxu0 %v506_v0 }
  0x38   :  { %410 = vmatpush3.bf16.msra.mxu1 %v449_v11 }
  0x39   :  { %428 = vmatpush3.bf16.msra.mxu0 %v456_v26 }
  0x3a   :  { %429 = vmatprep.subr.bf16.mxu0 %v506_v0 }
  0x3d   :  { %430 = vmatpush3.bf16.msra.mxu0 %v457_v27 }
  0xdf   :  { %v108_v19 = vpop.f32.mrf.mxu0 }
  0xe0   :  { %v109_v20 = vadd.f32 %v348_v18, %v108_v19 }
  0xe1   :  { %v393_v21 = vpop.f32.mrf.mxu0 }
  0xe2   :  { %v114_v22 = vmax.f32 %v109_v20, 0.0 }
  0xe3   :  { %v111_v23 = vpop.f32.mrf.mxu0 }
  0xe4   :  { %v115_v24 = vpack.c.bf16 %v114_v22, %v114_v22 }
  0xe5   :  { %v394_v25 = vpop.f32.mrf.mxu0 }
  0xe6   :  { %412 = vmatmul.mubr.bf16.vlgmr.msra.gmra.mxu1 %v115_v24 }
 0x1a6   :  { %v221_v29 = vpop.f32.mrf.mxu1 }
 0x1a7   :  { %v222_v30 = vadd.f32 %v351_v28, %v221_v29 }
 0x1a8   :  { %v413_v31 = vpop.f32.mrf.mxu1 }
 0x1a9   :  { %v227_v32 = vmax.f32 %v222_v30, 0.0 }
 0x1aa   :  { %v224_v33 = vpop.f32.mrf.mxu1 }
 0x1ab   :  { %v228_v34 = vpack.c.bf16 %v227_v32, %v227_v32 }
 0x1ac   :  { %v414_v35 = vpop.f32.mrf.mxu1 }
 0x1ad   :  { %432 = vmatmul.mubr.bf16.vlgmr.msra.gmra.mxu0 %v228_v34 }
 0x26d   :  { %v334_v37 = vpop.f32.mrf.mxu0 }
 0x26e   :  { %v335_v38 = vadd.f32 %v360_v36, %v334_v37 }
 0x26f   :  { %v433_v39 = vpop.f32.mrf.mxu0 }
 0x270   :  { %341 = vst.msk [vmem:[%s641_s7] sm:$0xff] %vm340_vm2, %v335_v38 }
 0x271   :  { %v337_v40 = vpop.f32.mrf.mxu0 }
 0x273   :  { %v434_v41 = vpop.f32.mrf.mxu0 }
 0x274   :  { %346 = vsyncpa [#allocation3], 1 }
 0x275   :  { %347 = vsyncpa [#allocation5], 1 }

</bundles_post_ra>
